<compile_context>
chip_gen: v7x
topology: tpu7x:2x2x1
jax: 0.10.0
libtpu: 0.0.40
codegen_flags: <defaults>
</compile_context>

<pallas_src>
import functools

import jax
import jax.numpy as jnp
from jax.experimental import pallas as pl
from jax.experimental.pallas import tpu as pltpu


def _downsampling_kernel(patches_ref, w_ref, gamma_ref, beta_ref, out_ref,
                         *, hw, hw_tile, eps, negative_slope):
    # patches_ref: (1, F, T) bf16          w_ref: (C_out, F) bf16
    # gamma_ref/beta_ref: (C_out, 1) f32   out_ref: (1, C_out, HW) f32
    # out_ref stays resident across the HW-tile ("arbitrary") grid axis and is
    # used as the conv-output accumulator.
    j = pl.program_id(1)

    # Conv hot path: one MXU matmul per (batch, HW-tile); bf16 in, f32 acc.
    y = jnp.dot(w_ref[...], patches_ref[0],
                preferred_element_type=jnp.float32)            # (C_out, T) f32

    if hw_tile == hw:            # static (trace-time) branch: single tile
        out_ref[0] = y
    else:
        start = pl.multiple_of(j * hw_tile, hw_tile)
        out_ref[0, :, pl.ds(start, hw_tile)] = y

    # After the last HW tile the full conv output for this batch element lives
    # in VMEM -> exact two-pass InstanceNorm + affine + LeakyReLU in place.
    @pl.when(j == pl.num_programs(1) - 1)
    def _():
        y_full = out_ref[0]                                    # (C_out, HW) f32
        mean = jnp.mean(y_full, axis=1, keepdims=True)         # (C_out, 1)
        centered = y_full - mean
        var = jnp.mean(centered * centered, axis=1, keepdims=True)
        y_hat = centered * jax.lax.rsqrt(var + eps)
        y_aff = y_hat * gamma_ref[...] + beta_ref[...]
        out_ref[0] = jnp.where(y_aff > 0, y_aff, negative_slope * y_aff)


def _im2col(x, kernel_size, stride, padding):
    """x: (N, C, H, W) -> patches (N, C*K*K, H_out*W_out); feature order
    f = c*K*K + kh*K + kw matches PyTorch Conv2d weight.reshape(C_out, -1)."""
    N, C, H, W = x.shape
    K = kernel_size
    H_out = (H + 2 * padding - K) // stride + 1
    W_out = (W + 2 * padding - K) // stride + 1
    xp = jnp.pad(x, ((0, 0), (0, 0), (padding, padding), (padding, padding)))
    cols = []
    for kh in range(K):
        for kw in range(K):
            cols.append(
                xp[:, :, kh:kh + stride * H_out:stride,
                          kw:kw + stride * W_out:stride])       # (N, C, Ho, Wo)
    patches = jnp.stack(cols, axis=2)                           # (N, C, K*K, Ho, Wo)
    patches = patches.reshape(N, C * K * K, H_out * W_out)      # (N, F, HW)
    return patches, H_out, W_out


def _pick_hw_tile(hw, f, *, target=2048, patch_budget_bytes=16 << 20):
    """Largest lane-friendly HW tile: multiple of 128 dividing hw, <= target,
    keeping the double-buffered bf16 patch tile inside `patch_budget_bytes`
    (sized for v7x's 64 MiB physical VMEM).  Falls back to full hw."""
    max_t = min(target, patch_budget_bytes // max(1, 2 * 2 * f))
    if hw <= max_t or hw % 128 != 0:
        return hw
    t = max(128, (max_t // 128) * 128)
    while t >= 128:
        if hw % t == 0:
            return t
        t -= 128
    return hw


def downsampling_forward(x, conv_weight, gamma, beta, *,
                         kernel_size=4, stride=2, padding=1,
                         eps=1e-5, negative_slope=0.3):
    """x: (N, C_in, H, W) NCHW. conv_weight: (C_out, C_in, K, K).
    gamma, beta: (C_out,). Returns (N, C_out, H_out, W_out) NCHW."""
    N, C_in, H, W = x.shape
    C_out = conv_weight.shape[0]
    K = kernel_size

    # TODO(synk): for v5e, fold the im2col into the kernel (memory_space=pl.ANY
    # + manual strided DMA) to avoid materializing the 4x-sized patches array.
    patches, H_out, W_out = _im2col(x, K, stride, padding)      # (N, F, HW)
    HW = H_out * W_out
    F = C_in * K * K

    # bf16 MXU operands (halves HBM/VMEM traffic for the dominant operand);
    # accumulation and all norm/affine/activation math stay in f32.
    patches = patches.astype(jnp.bfloat16)
    w_mat = conv_weight.reshape(C_out, F).astype(jnp.bfloat16)  # (C_out, F)
    gamma2 = gamma.reshape(C_out, 1).astype(jnp.float32)
    beta2 = beta.reshape(C_out, 1).astype(jnp.float32)

    T = _pick_hw_tile(HW, F)
    nt = HW // T

    kernel = functools.partial(_downsampling_kernel, hw=HW, hw_tile=T,
                               eps=eps, negative_slope=negative_slope)

    # VMEM budget: double-buffered bf16 patch tiles + resident f32 output block
    # (+ writeback buffer) + weights; kept well inside v7x's 64 MiB physical.
    vmem_need = (2 * F * T * 2) + (2 * C_out * HW * 4) + (C_out * F * 2) + (4 * 8 * 128 * 4)
    vmem_limit = int(min(max(2 * vmem_need, 32 << 20), 48 << 20))

    cost = pl.CostEstimate(
        flops=2 * N * HW * F * C_out,
        transcendentals=0,
        bytes_accessed=(N * F * HW * 2 + C_out * F * 2
                        + N * C_out * HW * 4 + 2 * C_out * 4),
    )

    out = pl.pallas_call(
        kernel,
        out_shape=jax.ShapeDtypeStruct((N, C_out, HW), jnp.float32),
        grid_spec=pltpu.PrefetchScalarGridSpec(
            num_scalar_prefetch=0,
            grid=(N, nt),
            in_specs=[
                pl.BlockSpec((1, F, T), lambda n, j: (n, 0, j)),
                pl.BlockSpec((C_out, F), lambda n, j: (0, 0)),
                pl.BlockSpec((C_out, 1), lambda n, j: (0, 0)),
                pl.BlockSpec((C_out, 1), lambda n, j: (0, 0)),
            ],
            out_specs=pl.BlockSpec((1, C_out, HW), lambda n, j: (n, 0, 0)),
        ),
        compiler_params=pltpu.CompilerParams(
            dimension_semantics=("parallel", "arbitrary"),
            vmem_limit_bytes=vmem_limit),
        cost_estimate=cost,
    )(patches, w_mat, gamma2, beta2)

    # (N, C_out, HW) -> NCHW: pure reshape, no transpose pass.
    return out.reshape(N, C_out, H_out, W_out)


def _reference(x, conv_weight, gamma, beta, *,
               stride=2, padding=1, eps=1e-5, negative_slope=0.3):
    y = jax.lax.conv_general_dilated(
        x.astype(jnp.float32), conv_weight.astype(jnp.float32),
        window_strides=(stride, stride),
        padding=((padding, padding), (padding, padding)),
        dimension_numbers=("NCHW", "OIHW", "NCHW"))
    mean = jnp.mean(y, axis=(2, 3), keepdims=True)
    var = jnp.mean((y - mean) ** 2, axis=(2, 3), keepdims=True)
    y_hat = (y - mean) / jnp.sqrt(var + eps)
    y_aff = y_hat * gamma.reshape(1, -1, 1, 1) + beta.reshape(1, -1, 1, 1)
    return jnp.where(y_aff > 0, y_aff, negative_slope * y_aff)


if __name__ == "__main__":
    key = jax.random.PRNGKey(0)
    k_x, k_w, k_g, k_b = jax.random.split(key, 4)

    N, C_in, H, W = 2, 4, 16, 16
    C_out, K = 8, 4

    x = jax.random.normal(k_x, (N, C_in, H, W), dtype=jnp.float32)
    # Deterministic synthetic parameters (Conv2d has bias=False).
    conv_weight = 0.1 * jax.random.normal(k_w, (C_out, C_in, K, K), dtype=jnp.float32)
    gamma = 1.0 + 0.1 * jax.random.normal(k_g, (C_out,), dtype=jnp.float32)
    beta = 0.1 * jax.random.normal(k_b, (C_out,), dtype=jnp.float32)

    out = downsampling_forward(x, conv_weight, gamma, beta)
    out = jax.block_until_ready(out)

    ref = _reference(x, conv_weight, gamma, beta)
    assert out.shape == ref.shape == (N, C_out, H // 2, W // 2), out.shape
    max_err = float(jnp.max(jnp.abs(out - ref)))
    # bf16 MXU operands (f32 accumulation) -> looser tolerance than pure f32.
    assert max_err < 5e-2, max_err

    print("KERNEL_OK")
</pallas_src>

<mosaic_0001>
module attributes {stable_mosaic.version = 11 : i64} {
  func.func @_downsampling_kernel(%arg0: i32, %arg1: i32, %arg2: memref<1x64x64xbf16, #tpu.memory_space<vmem>>, %arg3: memref<8x64xbf16, #tpu.memory_space<vmem>>, %arg4: memref<8x1xf32, #tpu.memory_space<vmem>>, %arg5: memref<8x1xf32, #tpu.memory_space<vmem>>, %arg6: memref<1x8x64xf32, #tpu.memory_space<vmem>>) attributes {dimension_semantics = [#tpu.dimension_semantics<parallel>, #tpu.dimension_semantics<arbitrary>], iteration_bounds = array<i64: 2, 1>, scalar_prefetch = 0 : i64, scratch_operands = 0 : i64, tpu.core_type = #tpu.core_type<tc>, window_params = [{transform_indices = @transform_0, window_bounds = array<i64: 1, 64, 64>}, {pipeline_mode = #tpu.pipeline_mode<synchronous>, transform_indices = @transform_1, window_bounds = array<i64: 8, 64>}, {pipeline_mode = #tpu.pipeline_mode<synchronous>, transform_indices = @transform_2, window_bounds = array<i64: 8, 1>}, {pipeline_mode = #tpu.pipeline_mode<synchronous>, transform_indices = @transform_3, window_bounds = array<i64: 8, 1>}, {transform_indices = @transform_4, window_bounds = array<i64: 1, 8, 64>}]} {
    %c0 = arith.constant 0 : index
    %c0_0 = arith.constant 0 : index
    %0 = vector.load %arg3[%c0, %c0_0] : memref<8x64xbf16, #tpu.memory_space<vmem>>, vector<8x64xbf16>
    %c0_1 = arith.constant 0 : index
    %c0_2 = arith.constant 0 : index
    %c0_3 = arith.constant 0 : index
    %1 = vector.load %arg2[%c0_1, %c0_2, %c0_3] : memref<1x64x64xbf16, #tpu.memory_space<vmem>>, vector<1x64x64xbf16>
    %2 = vector.shape_cast %1 : vector<1x64x64xbf16> to vector<64x64xbf16>
    %cst = arith.constant dense<0.000000e+00> : vector<8x64xf32>
    %3 = tpu.matmul %0, %2, %cst {dimension_numbers = #tpu.dot_dimension_numbers<[1], [0], [0], [1], [0, 0, 1, 1], [], []>} : vector<8x64xbf16>, vector<64x64xbf16>, vector<8x64xf32> -> vector<8x64xf32>
    %c0_4 = arith.constant 0 : index
    %c0_5 = arith.constant 0 : index
    %c0_6 = arith.constant 0 : index
    %4 = vector.load %arg6[%c0_4, %c0_5, %c0_6] : memref<1x8x64xf32, #tpu.memory_space<vmem>>, vector<1x8x64xf32>
    %5 = vector.shape_cast %4 : vector<1x8x64xf32> to vector<8x64xf32>
    %6 = vector.shape_cast %3 : vector<8x64xf32> to vector<1x8x64xf32>
    tpu.vector_store %arg6[%c0_4, %c0_5, %c0_6], %6 {strides = array<i32>} : memref<1x8x64xf32, #tpu.memory_space<vmem>>, vector<1x8x64xf32>,
    %c0_i32 = arith.constant 0 : i32
    %7 = arith.cmpi eq, %arg1, %c0_i32 : i32
    %8 = arith.extui %7 : i1 to i32
    %c0_i32_7 = arith.constant 0 : i32
    %9 = arith.cmpi ne, %8, %c0_i32_7 : i32
    scf.if %9 {
      %c0_8 = arith.constant 0 : index
      %c0_9 = arith.constant 0 : index
      %c0_10 = arith.constant 0 : index
      %10 = vector.load %arg6[%c0_8, %c0_9, %c0_10] : memref<1x8x64xf32, #tpu.memory_space<vmem>>, vector<1x8x64xf32>
      %11 = vector.shape_cast %10 : vector<1x8x64xf32> to vector<8x64xf32>
      %cst_11 = arith.constant dense<0.000000e+00> : vector<8xf32>
      %12 = vector.multi_reduction <add>, %11, %cst_11 [1] : vector<8x64xf32> to vector<8xf32>
      %13 = vector.shape_cast %12 : vector<8xf32> to vector<8x1xf32>
      %cst_12 = arith.constant 6.400000e+01 : f32
      %14 = vector.broadcast %cst_12 : f32 to vector<8x1xf32>
      %15 = arith.divf %13, %14 : vector<8x1xf32>
      %16 = vector.broadcast %15 : vector<8x1xf32> to vector<8x64xf32>
      %17 = arith.subf %11, %16 : vector<8x64xf32>
      %18 = arith.mulf %17, %17 : vector<8x64xf32>
      %cst_13 = arith.constant dense<0.000000e+00> : vector<8xf32>
      %19 = vector.multi_reduction <add>, %18, %cst_13 [1] : vector<8x64xf32> to vector<8xf32>
      %20 = vector.shape_cast %19 : vector<8xf32> to vector<8x1xf32>
      %cst_14 = arith.constant 6.400000e+01 : f32
      %21 = vector.broadcast %cst_14 : f32 to vector<8x1xf32>
      %22 = arith.divf %20, %21 : vector<8x1xf32>
      %cst_15 = arith.constant 9.99999974E-6 : f32
      %23 = vector.broadcast %cst_15 : f32 to vector<8x1xf32>
      %24 = arith.addf %22, %23 : vector<8x1xf32>
      %25 = math.rsqrt %24 : vector<8x1xf32>
      %26 = vector.broadcast %25 : vector<8x1xf32> to vector<8x64xf32>
      %27 = arith.mulf %17, %26 : vector<8x64xf32>
      %c0_16 = arith.constant 0 : index
      %c0_17 = arith.constant 0 : index
      %28 = vector.load %arg4[%c0_16, %c0_17] : memref<8x1xf32, #tpu.memory_space<vmem>>, vector<8x1xf32>
      %29 = vector.broadcast %28 : vector<8x1xf32> to vector<8x64xf32>
      %30 = arith.mulf %27, %29 : vector<8x64xf32>
      %c0_18 = arith.constant 0 : index
      %c0_19 = arith.constant 0 : index
      %31 = vector.load %arg5[%c0_18, %c0_19] : memref<8x1xf32, #tpu.memory_space<vmem>>, vector<8x1xf32>
      %32 = vector.broadcast %31 : vector<8x1xf32> to vector<8x64xf32>
      %33 = arith.addf %30, %32 : vector<8x64xf32>
      %cst_20 = arith.constant 0.000000e+00 : f32
      %34 = vector.broadcast %cst_20 : f32 to vector<8x64xf32>
      %35 = arith.cmpf ogt, %33, %34 : vector<8x64xf32>
      %cst_21 = arith.constant 3.000000e-01 : f32
      %36 = vector.broadcast %cst_21 : f32 to vector<8x64xf32>
      %37 = arith.mulf %36, %33 : vector<8x64xf32>
      %38 = arith.select %35, %33, %37 : vector<8x64xi1>, vector<8x64xf32>
      %c0_22 = arith.constant 0 : index
      %c0_23 = arith.constant 0 : index
      %c0_24 = arith.constant 0 : index
      %39 = vector.load %arg6[%c0_22, %c0_23, %c0_24] : memref<1x8x64xf32, #tpu.memory_space<vmem>>, vector<1x8x64xf32>
      %40 = vector.shape_cast %39 : vector<1x8x64xf32> to vector<8x64xf32>
      %41 = vector.shape_cast %38 : vector<8x64xf32> to vector<1x8x64xf32>
      tpu.vector_store %arg6[%c0_22, %c0_23, %c0_24], %41 {strides = array<i32>} : memref<1x8x64xf32, #tpu.memory_space<vmem>>, vector<1x8x64xf32>,
    } else {
    }
    return
  }
  func.func @transform_0(%arg0: i32, %arg1: i32) -> (i32, i32, i32) {
    %c0_i32 = arith.constant 0 : i32
    %c0_i32_0 = arith.constant 0 : i32
    return %arg0, %c0_i32, %arg1 : i32, i32, i32
  }
  func.func @transform_1(%arg0: i32, %arg1: i32) -> (i32, i32) {
    %c0_i32 = arith.constant 0 : i32
    %c0_i32_0 = arith.constant 0 : i32
    %c0_i32_1 = arith.constant 0 : i32
    return %c0_i32, %c0_i32_0 : i32, i32
  }
  func.func @transform_2(%arg0: i32, %arg1: i32) -> (i32, i32) {
    %c0_i32 = arith.constant 0 : i32
    %c0_i32_0 = arith.constant 0 : i32
    %c0_i32_1 = arith.constant 0 : i32
    return %c0_i32, %c0_i32_0 : i32, i32
  }
  func.func @transform_3(%arg0: i32, %arg1: i32) -> (i32, i32) {
    %c0_i32 = arith.constant 0 : i32
    %c0_i32_0 = arith.constant 0 : i32
    %c0_i32_1 = arith.constant 0 : i32
    return %c0_i32, %c0_i32_0 : i32, i32
  }
  func.func @transform_4(%arg0: i32, %arg1: i32) -> (i32, i32, i32) {
    %c0_i32 = arith.constant 0 : i32
    %c0_i32_0 = arith.constant 0 : i32
    %c0_i32_1 = arith.constant 0 : i32
    return %arg0, %c0_i32, %c0_i32_0 : i32, i32, i32
  }
}

</mosaic_0001>

<bundles_post_ra>
// kernel: tpu_custom_call.1
= control target key start
LH: loop header
LB: loop body
LE: loop exit
PB: predicated region body
PF: predicated region fallthrough
CT: control target
= control target key end

     0   :  { %9 = vsyncpa [#allocation3], 0  ;;  %s893_s0 = inlined_call_operand.hbm [shape: bf16[2,64,64], index: 0, kind: input, shape index: {}]   ;;  %s894_s1 = inlined_call_operand.vmem [shape: bf16[8,64], index: 1, kind: input, shape index: {}]   ;;  %s895_s2 = inlined_call_operand.vmem [shape: f32[8,1], index: 2, kind: input, shape index: {}]   ;;  %s896_s3 = inlined_call_operand.vmem [shape: f32[8,1], index: 3, kind: input, shape index: {}]   ;;  %s897_s4 = inlined_call_operand.hbm [shape: f32[2,8,64], index: 4, kind: output, shape index: {}]  }
   0x1   :  { %11 = vsyncpa [#allocation3 + $0x1], 0 }
   0x2   :  { %12 = vsyncpa [#allocation4], 0 }
   0x3   :  { %14 = vsyncpa [#allocation4 + $0x1], 0  ;;  %s699_s15 = smov 0   ;;  %s701_s16 = smov 0  }
   0x4   :  { %s703_s17 = smov 0   ;;  %s705_s18 = smov 0  }
   0x5   :  { %s707_s19 = smov 0   ;;  %s709_s20 = smov 0  }
   0x6 LB: > { %s441_s21 = sadd.s32 4294967295, %s665_s20   ;;  %s442_s22 = sadd.s32 4294967294, %s665_s20   ;;  %s665_s20 = sphi %s709_s20, %s20_s20   ;;  %s661_s19 = sphi %s707_s19, %s912_s19   ;;  %s657_s18 = sphi %s705_s18, %s911_s18   ;;  %s653_s17 = sphi %s703_s17, %s910_s17   ;;  %s649_s16 = sphi %s701_s16, %s909_s16   ;;  %s645_s15 = sphi %s699_s15, %s908_s15  }
   0x7   : > { %s32_s23 = sadd.s32 1, %s661_s19  ;;  %s41_s24 = sadd.s32 1, %s653_s17 }
   0x8   : > { %p34_p0 = scmp.ge.s32.totalorder %s32_s23, 2  ;;  %p48_p1 = scmp.ne.s32.totalorder %s653_s17, %s649_s16 }
   0x9   : > { %p49_p2 = scmp.eq.s32.totalorder %s665_s20, 0  ;;  %p54_p3 = scmp.ne.s32.totalorder %s649_s16, %s645_s15 }
   0xa   : > { %s914_s23 = smov (%p34_p0, %s32_s23), 0  ;;  %p55_p5 = scmp.eq.s32.totalorder %s441_s21, 0 }
   0xb   : > { %p740_p4 = por %p49_p2, %p48_p1  ;;  %s36_s26 = ssub.s32 %s661_s19, %s914_s23 }
   0xc   : > { %p141_p6 = scmp.eq.s32.totalorder %s441_s21, 1  ;;  %p39_p7 = scmp.eq.s32.totalorder %s36_s26, 0 }
   0xd   : > { %p746_p8 = por %p55_p5, %p54_p3  ;;  %p147_p10 = scmp.eq.s32.totalorder %s442_s22, 1 }
   0xe   : > { %p750_p9 = por %p141_p6, %p48_p1  ;;  %p490_p13 = scmp.lt.s32.totalorder %s665_s20, 2 }
   0xf   : > { %s755_s29 = scalar_select %p39_p7, %s653_s17, %s41_s24  }
  0x10   : > { %s901_s28 = scalar_select %p750_p9, 1, 0 }
  0x11   : > { %p757_p11 = por %p147_p10, %p54_p3  ;;  %s176_s5 = sand.u32 1, %s653_s17  }
  0x12   : > { %s445_s6 = sshll.u32 %s176_s5, 5  ;;  %s460_s7 = sshll.u32 %s661_s19, 9 }
  0x13   : > { %s902_s30 = scalar_select %p757_p11, 1, 0 }
  0x14   : > { %s768_s10 = scalar_lea.hbm %s893_s0, %s460_s7  ;;  %s180_s11 = scalar_lea.vmem [#allocation2], %s445_s6 }
  0x15   : > { %s188_s12 = sshll.u32 %s180_s11, 4  ;;  %p774_p0 = pnand %p490_p13, %p740_p4  ;;  %s770_s12 = int_to_ptr.vmem [resolvable:$true] %s188_s12 }
  0x16   : > { %s779_s14 = scalar_lea.sflag [#allocation3], %s176_s5  ;;  %s553_s21 = scalar_lea.hbm %s768_s10, 512 }
  0x17   : > { %p554_p2 = scmp.ne.s32.totalorder %s768_s10, %s553_s21  ;;  %p555_p3 = pneg %p774_p0 }
  0x18   : > { %s558_s25 = scalar_lea.hbm %s893_s0, 1024  ;;  %p559_p4 = scmp.lt.u32.totalorder %s768_s10, %s893_s0 }
  0x19   : > { %p556_p5 = pnand %p555_p3, %p554_p2  ;;  %p560_p7 = scmp.lt.u32.totalorder %s558_s25, %s553_s21 }
  0x1a   : > { %p562_p13 = scmp.lt.u32.totalorder %s553_s21, %s768_s10 }
  0x1b   : > { %p557_p6 = pneg %p556_p5  ;;  %p561_p10 = por %p560_p7, %p559_p4 }
  0x1d   : > { %p563_p12 = por %p562_p13, %p561_p10 }
  0x1f   : > { %p564_p1 = pnand %p563_p12, %p557_p6 }
  0x21   : > { %567 = shalt.err (!%p564_p1)
}
  0x22   : > { %s568_s5 = scalar_lea.vmem %s770_s12, 512  ;;  %s667_s7 = smov [#allocation2]  }
  0x23   : > { %p569_p2 = scmp.ne.s32.totalorder %s770_s12, %s568_s5  ;;  %s573_s8 = sshll.u32 %s667_s7, 4  ;;  %s574_s8 = int_to_ptr.vmem [resolvable:$false] %s573_s8 }
  0x24   : > { %s575_s9 = scalar_lea.vmem %s574_s8, 1024  ;;  %p576_p9 = scmp.lt.s32.totalorder %s770_s12, %s574_s8 }
  0x25   : > { %p571_p5 = pnand %p569_p2, %p555_p3  ;;  %p577_p4 = scmp.lt.s32.totalorder %s575_s9, %s568_s5 }
  0x27   : > { %p572_p11 = pneg %p571_p5  ;;  %p578_p7 = por %p577_p4, %p576_p9 }
  0x29   : > { %p579_p10 = pnand %p578_p7, %p572_p11 }
  0x2b   : > { %582 = shalt.err (!%p579_p10)
}
  0x2c   : > { %s668_s11 = smov 64   ;;  %s669_s21 = smov 4  }
  0x2d   : > { %485 = dma.hbm_to_vmem [thread:$0]  (!%p774_p0), %s768_s10, 512, %s770_s12, %s779_s14, %s668_s11, %s668_s11, %s669_s21  }
  0x2e   : > { %p196_p12 = scmp.lt.s32.totalorder %s665_s20, 3  ;;  %p904_p1 = scmp.ge.s32.totalorder %s665_s20, 1 }
  0x30   : > { %p197_p3 = pnand %p904_p1, %p196_p12 }
  0x31   : > { %s811_s22 = sand.u32 (!%p197_p3), 1, %s649_s16  }
  0x32   : > { %200 = sbr.rel (%p197_p3) target bundleno = 625 (0x271), region = 36  ;;  %s449_s24 = sshll.u32 (!%p197_p3), %s811_s22, 5 }
  0x33   : > { %s203_s25 = scalar_lea.sflag (!%p197_p3), [#allocation3], %s811_s22  ;;  %s206_s26 = scalar_lea.vmem (!%p197_p3), [#allocation2], %s449_s24 }
  0x39   : > { %636 = dma.done.wait (%p746_p8), %s203_s25, 512  }
  0x3a   : > { %638 = vsyncadd (%p746_p8), %s203_s25, 4294966784  ;;  %v670_v0 = vmov 0.0   ;;  %vm671_vm0 = vmmov 0   ;;  %v547_v1 = vld [vmem:[%s206_s26] sm:$0xff]   ;;  %v548_v2 = vld [vmem:[%s206_s26 + $0x8] sm:$0xff]   ;;  %vm265_vm1 = vcmask 523264  }
  0x3b   : > { %466 = vmatprep.subr.bf16.mxu0 %v670_v0  ;;  %474 = vmatprep.mubr.msk.bf16.mxu0 %vm671_vm0, %v670_v0  ;;  %v549_v3 = vld [vmem:[%s206_s26 + $0x10] sm:$0xff]   ;;  %v550_v4 = vld [vmem:[%s206_s26 + $0x18] sm:$0xff]   ;;  %v232_v5 = vld [vmem:[%s894_s1] sm:$0xf]  ;;  %s450_s27 = sshll.u32 %s811_s22, 3  ;;  %v672_v13 = vmov 0  }
  0x3c   : > { %467 = vmatpush3.bf16.msra.mxu0 %v547_v1  ;;  %s824_s13 = scalar_lea.vmem [#allocation5], %s450_s27  ;;  %v329_v12 = vld [vmem:[%s895_s2] sm:$0xff]  ;;  %545 = vset.pattern.permute.xlu1 %v672_v13  ;;  %s457_s8 = sshll.u32 %s657_s18, 7 }
  0x3d   : > { %468 = vmatprep.subr.bf16.mxu0 %v670_v0  ;;  %546 = vset.pattern.permute.xlu0 %v672_v13  ;;  %v336_v14 = vld [vmem:[%s896_s3] sm:$0xff]  ;;  %s361_s9 = sshll.u32 %s824_s13, 4  ;;  %s842_s24 = scalar_lea.hbm %s897_s4, %s457_s8  ;;  %s844_s9 = int_to_ptr.vmem [resolvable:$true] %s361_s9 }
  0x3e   : > { %332 = vperm.xlu1 %545, %v329_v12   ;;  %s348_s25 = scalar_lea.sflag [#allocation4], %s811_s22  ;;  %s583_s26 = scalar_lea.vmem %s844_s9, 128 }
  0x3f   : > { %p584_p8 = scmp.ne.s32.totalorder %s844_s9, %s583_s26  ;;  %p905_p9 = scmp.ne.s32.totalorder %s901_s28, 0 }
  0x40   : > { %469 = vmatpush3.bf16.msra.mxu0 %v548_v2  ;;  %s673_s18 = smov [#allocation5]  }
  0x41   : > { %470 = vmatprep.subr.bf16.mxu0 %v670_v0  ;;  %p585_p11 = pnand %p584_p8, %p905_p9  ;;  %s587_s10 = sshll.u32 %s673_s18, 4  ;;  %s588_s10 = int_to_ptr.vmem [resolvable:$false] %s587_s10 }
  0x42   : > { %339 = vperm.xlu1 %545, %v336_v14   ;;  %s589_s12 = scalar_lea.vmem %s588_s10, 256  ;;  %p590_p6 = scmp.lt.s32.totalorder %s844_s9, %s588_s10 }
  0x43   : > { %p586_p0 = pneg %p585_p11  ;;  %p591_p13 = scmp.lt.s32.totalorder %s589_s12, %s583_s26 }
  0x44   : > { %471 = vmatpush3.bf16.msra.mxu0 %v549_v3 }
  0x45   : > { %472 = vmatprep.subr.bf16.mxu0 %v670_v0  ;;  %p592_p2 = por %p591_p13, %p590_p6 }
  0x47   : > { %p593_p5 = pnand %p592_p2, %p586_p0 }
  0x48   : > { %473 = vmatpush3.bf16.msra.mxu0 %v550_v4 }
  0x4b   : > { %475 = vmatmul.mubr.msk.bf16.vlgmr.msra.gmra.mrb[0].mxu0 %vm265_vm1, %v232_v5 }
  0xbd   : > { %v333_v23 = vpop.permute.xlu1 %332 }
  0xc1   : > { %v340_v27 = vpop.permute.xlu1 %339 }
 0x11e   : > { %v303_v6 = vpop.f32.mrb[0].mxu0 }
 0x11f   : > { %309 = vst.msk [vmem:[%s824_s13] sm:$0xff] %vm265_vm1, %v303_v6  ;;  %v476_v7 = vpop.f32.mrb[1].mxu0 }
 0x120   : > { %v306_v8 = vpop.f32.mrb[2].mxu0 }
 0x121   : > { %v477_v9 = vpop.f32.mrb[3].mxu0 }
 0x126   : > { %v314_v10 = vld [vmem:[%s824_s13] sm:$0xff] }
 0x127   : > { %v315_v11 = vsel %vm265_vm1, %v314_v10, 0.0 }
 0x128   : > { %316 = vadd.xlane.f32.xlu0 %v315_v11 }
 0x1b5   : > { %v317_v15 = vpop.xlane.xlu0 %316 }
 0x1b6   : > { %v319_v16 = vmul.f32 0.015625, %v317_v15 }
 0x1b8   : > { %v320_v17 = vsub.f32 %v314_v10, %v319_v16 }
 0x1ba   : > { %v321_v18 = vmul.f32 %v320_v17, %v320_v17 }
 0x1bc   : > { %v322_v19 = vsel %vm265_vm1, %v321_v18, 0.0 }
 0x1bd   : > { %323 = vadd.xlane.f32.xlu0 %v322_v19 }
 0x24a   : > { %v324_v20 = vpop.xlane.xlu0 %323 }
 0x24b   : > { %v325_v21 = vmul.f32 0.015625, %v324_v20 }
 0x24d   : > { %v326_v22 = vadd.f32 1e-05, %v325_v21 }
 0x24f   : > { %551 = vrsqrt.f32 %v326_v22 }
 0x259   : > { %v552_v24 = vpop.eup %551 }
 0x25a   : > { %v328_v25 = vmul.f32 %v552_v24, %v320_v17 }
 0x25c   : > { %v335_v26 = vmul.f32 %v333_v23, %v328_v25 }
 0x25e   : > { %v342_v28 = vadd.f32 %v340_v27, %v335_v26 }
 0x260   : > { %vm343_vm2 = vcmp.gt.f32.partialorder %v342_v28, 0.0  ;;  %v344_v29 = vmul.f32 0.3, %v342_v28 }
 0x262   : > { %v345_v30 = vsel %vm343_vm2, %v342_v28, %v344_v29 }
 0x263   : > { %346 = vst.msk [vmem:[%s824_s13] sm:$0xff] %vm265_vm1, %v345_v30 }
 0x264   : > { %596 = shalt.err (!%p593_p5)
}
 0x265   : > { %s597_s22 = scalar_lea.hbm %s842_s24, 128  ;;  %s601_s14 = scalar_lea.hbm %s897_s4, 256 }
 0x266   : > { %p598_p4 = scmp.ne.s32.totalorder %s842_s24, %s597_s22  ;;  %p602_p12 = scmp.lt.u32.totalorder %s842_s24, %s897_s4 }
 0x267   : > { %p603_p1 = scmp.lt.u32.totalorder %s601_s14, %s597_s22  ;;  %p605_p8 = scmp.lt.u32.totalorder %s597_s22, %s842_s24 }
 0x268   : > { %p599_p7 = pnand %p598_p4, %p905_p9 }
 0x269   : > { %p604_p3 = por %p603_p1, %p602_p12 }
 0x26a   : > { %p600_p10 = pneg %p599_p7 }
 0x26b   : > { %p606_p11 = por %p605_p8, %p604_p3 }
 0x26d   : > { %p607_p0 = pnand %p606_p11, %p600_p10 }
 0x26f   : > { %610 = shalt.err (!%p607_p0)
}
 0x270   : > { %480 = dma.vmem_to_hbm [thread:$0]  (%p905_p9), %s844_s9, 128, %s842_s24, %s348_s25  }
 0x271 PF: > { %s373_s7 = sand.u32 1, %s645_s15   ;;  %p906_p6 = scmp.ne.s32.totalorder %s902_s30, 0 }
 0x272   : > { %p907_p13 = scmp.ge.s32.totalorder %s665_s20, 2  ;;  %s374_s8 = scalar_lea.sflag [#allocation4], %s373_s7 }
 0x274   : > { %p487_p2 = pnand %p907_p13, %p906_p6 }
 0x276   : > { %640 = dma.done.wait (!%p487_p2), %s374_s8, 128  }
 0x277   : > { %642 = vsyncadd (!%p487_p2), %s374_s8, 4294967168  ;;  %s20_s20 = sadd.s32 1, %s665_s20   ;;  %s908_s15 = smov %s649_s16 }
 0x278   : > { %p17_p5 = scmp.ge.s32.totalorder %s20_s20, 4   ;;  %s909_s16 = smov %s653_s17 }
 0x279   : > { %s910_s17 = smov %s755_s29  ;;  %s911_s18 = smov %s661_s19 }
 0x27a   : > { %s912_s19 = smov %s914_s23  ;;  %19 = sbr.rel (!%p17_p5) target bundleno = 6 (0x6), region = 85 }
 0x281   :  { %379 = vsyncpa [#allocation3], 1 }
 0x282   :  { %381 = vsyncpa [#allocation3 + $0x1], 1 }
 0x283   :  { %382 = vsyncpa [#allocation4], 1 }
 0x284   :  { %384 = vsyncpa [#allocation4 + $0x1], 1 }

</bundles_post_ra>
